<compile_context>
chip_gen: v5e
topology: v5e:2x2
jax: 0.10.0
libtpu: 0.0.40
codegen_flags: <defaults>
</compile_context>

<pallas_src>
import functools
import itertools

import numpy as np
import jax
import jax.numpy as jnp
from jax.experimental import pallas as pl
from jax.experimental.pallas import tpu as pltpu


# ----------------------------------------------------------------------------
# Hamiltonian construction (module-build-time constant setup -> plain numpy)
# ----------------------------------------------------------------------------
def single_photon_hamiltonian_bs(modes, mode_1, mode_2):
    H = np.zeros((modes, modes), dtype=np.float64)
    H[mode_1, mode_2] = -1.0
    H[mode_2, mode_1] = +1.0
    return H


def fock_basis(n, m):
    """Deterministic ordering of occupation-number vectors: n photons over m modes."""
    basis = []
    for comb in itertools.combinations_with_replacement(range(m), n):
        occ = [0] * m
        for c in comb:
            occ[c] += 1
        basis.append(tuple(occ))
    return basis


def photon_hamiltonian(HS, n):
    """Second-quantized lift: H_Fock[j, i] = sum_{p,q} HS[p,q] <j| a_p^dag a_q |i>."""
    m = HS.shape[0]
    basis = fock_basis(n, m)
    index = {b: i for i, b in enumerate(basis)}
    D = len(basis)
    H = np.zeros((D, D), dtype=np.float64)
    for i, occ in enumerate(basis):
        for p in range(m):
            for q in range(m):
                if HS[p, q] == 0.0 or occ[q] == 0:
                    continue
                new = list(occ)
                new[q] -= 1
                amp = np.sqrt(occ[q]) * np.sqrt(new[p] + 1)
                new[p] += 1
                j = index[tuple(new)]
                H[j, i] += HS[p, q] * amp
    return H


def hamiltonian_bs(photons, modes, mode_1, mode_2):
    HS = single_photon_hamiltonian_bs(modes, mode_1, mode_2)
    return photon_hamiltonian(HS, photons)          # float64


# ----------------------------------------------------------------------------
# Offline spectral basis:  expm(-theta*H) = sum_k coef_k(theta) * M_k
# ----------------------------------------------------------------------------
LANES = 128      # output lane width (unmasked lane-dense store)
CDIM = 16        # padded per-group contraction size: next multiple of 8 >= D = 10
ROWS = 8         # minimal sublane count for an f32 tile; row 0 carries the state


def skew_expm_basis(H, tol=1e-8):
    """H real skew-symmetric.  Returns (kinds, mus, mats) with
    expm(-theta*H) = sum_k c_k(theta) * mats[k],
    c_k = 1 ('const'), cos(mu*theta) ('cos') or sin(mu*theta) ('sin')."""
    Hd = np.asarray(H, dtype=np.float64)
    A = 1j * Hd                              # Hermitian
    lam, V = np.linalg.eigh(A)               # H = V diag(-i lam) V^H
    # expm(-theta*H) = V diag(exp(+i theta lam)) V^H
    kinds, mus, mats = [], [], []

    zero_mask = np.abs(lam) <= tol
    if zero_mask.any():
        Vz = V[:, zero_mask]
        P0 = Vz @ Vz.conj().T
        kinds.append("const"); mus.append(0.0); mats.append(P0.real)

    pos = np.sort(lam[lam > tol])
    groups = []
    for v in pos:
        if groups and abs(v - groups[-1][-1]) <= 1e-6 * max(1.0, abs(v)):
            groups[-1].append(v)
        else:
            groups.append([v])
    for g in groups:
        mu = float(np.mean(g))
        ip = np.abs(lam - mu) <= 1e-6 * max(1.0, mu)
        im = np.abs(lam + mu) <= 1e-6 * max(1.0, mu)
        Vp, Vm = V[:, ip], V[:, im]
        Pp = Vp @ Vp.conj().T
        Pm = Vm @ Vm.conj().T
        Mc = Pp + Pm                 # coefficient cos(mu*theta)
        Ms = 1j * (Pp - Pm)          # coefficient sin(mu*theta)
        kinds.append("cos"); mus.append(mu); mats.append(Mc.real)
        kinds.append("sin"); mus.append(mu); mats.append(Ms.real)
    return kinds, mus, mats


def build_bs_fock_constants(H_np):
    """One-time setup.

    Returns (kinds, mus, mats_stacked, D) where mats_stacked has shape (K*CDIM, LANES):
    rows [k*CDIM : k*CDIM+D] of group k hold M_k^T (zero padded), so that
        y_row = [c_0*x | c_1*x | ... | c_{K-1}*x] @ mats_stacked  ==  (expm(-theta*H) @ x)^T.
    """
    Hd = np.asarray(H_np, dtype=np.float64)
    kinds, mus, mats = skew_expm_basis(Hd)
    D = Hd.shape[0]
    K = len(mats)

    # One-time sanity checks of the spectral decomposition (non-circular):
    #   R(0) == I   and   dR/dtheta|_0 == -H
    R0 = np.zeros_like(Hd)
    dR0 = np.zeros_like(Hd)
    for kind, mu, M in zip(kinds, mus, mats):
        if kind in ("const", "cos"):
            R0 += M
        if kind == "sin":
            dR0 += mu * M
    assert np.allclose(R0, np.eye(D), atol=1e-10), "spectral basis: R(0) != I"
    assert np.allclose(dR0, -Hd, atol=1e-10), "spectral basis: R'(0) != -H"

    mats_stacked = np.zeros((K * CDIM, LANES), dtype=np.float32)
    for k, M in enumerate(mats):
        mats_stacked[k * CDIM:k * CDIM + D, :D] = M.T.astype(np.float32)
    return tuple(kinds), tuple(float(m) for m in mus), jnp.asarray(mats_stacked), D


# ----------------------------------------------------------------------------
# Pallas kernel: one VPU multiply (fold coefficients into lane groups) + one MXU matmul
# ----------------------------------------------------------------------------
def bs_fock_kernel(coef_ref, x_ref, mats_ref, o_ref):
    # x_ref:    (8, K*CDIM)   row 0 = [x | x | ... | x]  (x zero-padded to CDIM per group)
    # coef_ref: (1, K*CDIM)   lane-group k = coef_k (broadcast over sublanes)
    # mats_ref: (K*CDIM, 128) stacked transposed basis matrices (constant)
    xc = x_ref[...] * coef_ref[...]                                   # single VPU multiply
    o_ref[...] = jnp.dot(xc, mats_ref[...],
                         preferred_element_type=jnp.float32)          # single MXU pass


def bs_fock_forward(kinds, mus, mats_stacked, D, angle, input_state):
    """out = expm(-H*angle) @ input_state using the precomputed spectral basis."""
    K = len(kinds)
    angle = angle.astype(jnp.float32)

    # Handful of scalar trig coefficients (cheap; fused under jit).
    coefs = []
    for kind, mu in zip(kinds, mus):
        if kind == "const":
            coefs.append(jnp.ones((), jnp.float32))
        elif kind == "cos":
            coefs.append(jnp.cos(angle * mu).astype(jnp.float32))
        else:
            coefs.append(jnp.sin(angle * mu).astype(jnp.float32))
    coeffs = jnp.stack(coefs)                                   # (K,)
    coef_bcast = jnp.repeat(coeffs, CDIM)[None, :]              # (1, K*CDIM)

    # State, zero-padded to CDIM and tiled once per basis group, in row 0 of a minimal f32 tile.
    x16 = jnp.zeros((CDIM,), jnp.float32).at[:D].set(input_state.astype(jnp.float32))
    x_row = jnp.tile(x16, K)                                    # (K*CDIM,)
    x_pad = jnp.zeros((ROWS, K * CDIM), jnp.float32).at[0].set(x_row)

    out = pl.pallas_call(
        bs_fock_kernel,
        out_shape=jax.ShapeDtypeStruct((ROWS, LANES), jnp.float32),
        in_specs=[
            pl.BlockSpec(memory_space=pltpu.MemorySpace.VMEM),   # coefficients (1, K*CDIM)
            pl.BlockSpec(memory_space=pltpu.MemorySpace.VMEM),   # tiled state   (8, K*CDIM)
            pl.BlockSpec(memory_space=pltpu.MemorySpace.VMEM),   # stacked basis (K*CDIM, 128)
        ],
        out_specs=pl.BlockSpec(memory_space=pltpu.MemorySpace.VMEM),
    )(coef_bcast, x_pad, mats_stacked)

    return out[0, :D]


# ----------------------------------------------------------------------------
# Driver
# ----------------------------------------------------------------------------
if __name__ == "__main__":
    # module config: n=2 photons, m=4 modes, beamsplitter on modes (0, 1)  ->  D = C(5, 2) = 10
    n_photons, n_modes, m1, m2 = 2, 4, 0, 1
    H_np = hamiltonian_bs(n_photons, n_modes, m1, m2)            # (D, D) float64
    D = H_np.shape[0]
    H = jnp.asarray(H_np, dtype=jnp.float32)

    # one-time constant setup (hoisted out of the forward path)
    kinds, mus, mats_stacked, D = build_bs_fock_constants(H_np)

    # jit the whole forward with constants closed over: one fused executable per call
    forward = jax.jit(functools.partial(bs_fock_forward, kinds, mus, mats_stacked, D))

    key = jax.random.PRNGKey(0)
    k_angle, k_state = jax.random.split(key)
    angle = jax.random.uniform(k_angle, (), dtype=jnp.float32)          # torch.rand(()) analogue
    input_state = jax.random.normal(k_state, (D,), dtype=jnp.float32)
    input_state = input_state / jnp.linalg.norm(input_state)            # a valid state vector

    out = forward(angle, input_state)
    out = jax.block_until_ready(out)

    # reference check (plain JAX, outside the kernel)
    U_ref = jax.scipy.linalg.expm(-1.0 * H * angle)
    ref = U_ref @ input_state
    np.testing.assert_allclose(np.asarray(out), np.asarray(ref), rtol=2e-4, atol=2e-5)

    print("KERNEL_OK")
</pallas_src>

<mosaic_0001>
module attributes {stable_mosaic.version = 11 : i64} {
  func.func @bs_fock_kernel(%arg0: memref<1x80xf32, #tpu.memory_space<vmem>>, %arg1: memref<8x80xf32, #tpu.memory_space<vmem>>, %arg2: memref<80x128xf32, #tpu.memory_space<vmem>>, %arg3: memref<8x128xf32, #tpu.memory_space<vmem>>) attributes {dimension_semantics = [], scalar_prefetch = 0 : i64, scratch_operands = 0 : i64, tpu.core_type = #tpu.core_type<tc>} {
    %c0 = arith.constant 0 : index
    %c0_0 = arith.constant 0 : index
    %0 = vector.load %arg1[%c0, %c0_0] : memref<8x80xf32, #tpu.memory_space<vmem>>, vector<8x80xf32>
    %c0_1 = arith.constant 0 : index
    %c0_2 = arith.constant 0 : index
    %1 = vector.load %arg0[%c0_1, %c0_2] : memref<1x80xf32, #tpu.memory_space<vmem>>, vector<1x80xf32>
    %2 = vector.broadcast %1 : vector<1x80xf32> to vector<8x80xf32>
    %3 = arith.mulf %0, %2 : vector<8x80xf32>
    %c0_3 = arith.constant 0 : index
    %c0_4 = arith.constant 0 : index
    %4 = vector.load %arg2[%c0_3, %c0_4] : memref<80x128xf32, #tpu.memory_space<vmem>>, vector<80x128xf32>
    %cst = arith.constant dense<0.000000e+00> : vector<8x128xf32>
    %5 = tpu.matmul %3, %4, %cst {dimension_numbers = #tpu.dot_dimension_numbers<[1], [0], [0], [1], [0, 0, 1, 1], [], []>} : vector<8x80xf32>, vector<80x128xf32>, vector<8x128xf32> -> vector<8x128xf32>
    %c0_5 = arith.constant 0 : index
    %c0_6 = arith.constant 0 : index
    %6 = vector.load %arg3[%c0_5, %c0_6] : memref<8x128xf32, #tpu.memory_space<vmem>>, vector<8x128xf32>
    tpu.vector_store %arg3[%c0_5, %c0_6], %5 {strides = array<i32>} : memref<8x128xf32, #tpu.memory_space<vmem>>, vector<8x128xf32>,
    return
  }
}

</mosaic_0001>

<bundles_post_ra>
// kernel: tile.8
= control target key start
LH: loop header
LB: loop body
LE: loop exit
PB: predicated region body
PF: predicated region fallthrough
CT: control target
= control target key end

     0   :  { %s22_s0 = inlined_call_operand.vmem [shape: f32[16], index: 0, kind: input, shape index: {}]   ;;  %s23_s1 = inlined_call_operand.vmem [shape: f32[5,16], index: 1, kind: output, shape index: {}]  }
   0x1   :  { %v4_v0 = vld [vmem:[%s22_s0] ss:$0 sm:$0xff] }
   0x2   :  { %5 = vst [vmem:[%s23_s1] sm:$0xff] %v4_v0 }

// kernel: bs_fock_forward.1
= control target key start
LH: loop header
LB: loop body
LE: loop exit
PB: predicated region body
PF: predicated region fallthrough
CT: control target
= control target key end

     0   :  { %8 = vsyncpa [#allocation3], 0  ;;  %s107_s15 = smov [#allocation2]   ;;  %s108_s17 = smov 128   ;;  %s142_s0 = inlined_call_operand.vmem [shape: f32[1,80], index: 0, kind: input, shape index: {}]   ;;  %s143_s1 = inlined_call_operand.vmem [shape: f32[8,80], index: 1, kind: input, shape index: {}]   ;;  %s144_s2 = inlined_call_operand.hbm [shape: f32[80,128], index: 2, kind: input, shape index: {}]   ;;  %s145_s3 = inlined_call_operand.vmem [shape: f32[8,128], index: 3, kind: output, shape index: {}]  }
   0x1   :  { %s17_s14 = sshll.u32 %s144_s2, 4  ;;  %s19_s16 = sshll.u32 %s107_s15, 4  ;;  %s18_s14 = int_to_ptr.hbm [resolvable:$true] %s17_s14  ;;  %s20_s16 = int_to_ptr.vmem [resolvable:$true] %s19_s16 }
   0x2   :  { %s109_s18 = smov 8  }
   0x3   :  { %25 = dma.hbm_to_vmem [thread:$0]  %s18_s14, 1280, %s20_s16, [#allocation3], %s108_s17, %s108_s17, %s109_s18  }
   0x4   :  { %105 = dma.done.wait [#allocation3], 1280  }
   0x5   :  { %106 = vsyncadd [#allocation3], 4294966016  ;;  %v45_v0 = vld [vmem:[#allocation2 + $0x48] sm:$0xff]  ;;  %v44_v1 = vld [vmem:[#allocation2 + $0x40] sm:$0xff]  ;;  %vm46_vm0 = vcmask 654336  }
   0x6   :  { %56 = vmatpush.msra.mxu0 %v45_v0  ;;  %v43_v2 = vld [vmem:[#allocation2 + $0x38] sm:$0xff]  ;;  %v42_v3 = vld [vmem:[#allocation2 + $0x30] sm:$0xff]  ;;  %v41_v4 = vld [vmem:[#allocation2 + $0x28] sm:$0xff] }
   0x7   :  { %v40_v5 = vld [vmem:[#allocation2 + $0x20] sm:$0xff]  ;;  %v39_v6 = vld [vmem:[#allocation2 + $0x18] sm:$0xff]  ;;  %v38_v7 = vld [vmem:[#allocation2 + $0x10] sm:$0xff] }
   0x8   :  { %57 = vmatpush.msra.mxu0 %v44_v1  ;;  %v80_v8 = vld [vmem:[%s142_s0] ss:$0 sm:$0xff]  ;;  %v37_v10 = vld [vmem:[#allocation2 + $0x8] sm:$0xff] }
   0x9   :  { %v30_v9 = vld [vmem:[%s143_s1] sm:$0xff] }
   0xa   :  { %58 = vmatpush.msra.mxu0 %v43_v2  ;;  %v36_v11 = vld [vmem:[#allocation2] sm:$0xff]  ;;  %v35_v12 = vmul.f32 %v80_v8, %v30_v9 }
   0xc   :  { %59 = vmatpush.msra.mxu0 %v42_v3 }
   0xe   :  { %60 = vmatpush.msra.mxu0 %v41_v4 }
  0x10   :  { %61 = vmatpush.msra.mxu0 %v40_v5 }
  0x12   :  { %62 = vmatpush.msra.mxu0 %v39_v6 }
  0x14   :  { %63 = vmatpush.msra.mxu0 %v38_v7 }
  0x16   :  { %64 = vmatpush.msra.mxu0 %v37_v10 }
  0x18   :  { %65 = vmatpush.msra.mxu0 %v36_v11 }
  0x19   :  { %76 = vmatmul.msk.f32.vlgmr.msra.gmra.mxu0 %vm46_vm0, %v35_v12 }
  0x96   :  { %v67_v13 = vpop.f32.mrf.mxu0 }
  0x97   :  { %70 = vst [vmem:[%s145_s3] sm:$0xff] %v67_v13 }
  0x98   :  { %75 = vsyncpa [#allocation3], 1 }

</bundles_post_ra>
